<compile_context>
chip_gen: v7x
topology: tpu7x:2x2x1
jax: 0.10.0
libtpu: 0.0.40
codegen_flags: <defaults>
</compile_context>

<pallas_src>
import functools
import math

import jax
import jax.numpy as jnp
from jax import lax
from jax.experimental import pallas as pl
from jax.experimental.pallas import tpu as pltpu

INPUT_SIZE = 784      # 28 * 28
NUM_CLASSES = 10
N_PAD = 128           # lane-dense padded class dim (matches 128-lane vreg / MXU)
MAX_TILE_B = 2048     # batch-tile ceiling (review: 1024-2048 v5e/v6e, 2048+ v7x)


def _round_up(x, m):
    return (x + m - 1) // m * m


def linear_kernel(x_ref, w_ref, b_ref, o_ref):
    # x_ref: (tile_b, 784)  f32   -- cast to bf16 in-kernel (VPU, free slots)
    # w_ref: (N_PAD, 784)   bf16  -- native nn.Linear row layout, zero-padded,
    #                              resident in VMEM (constant index_map)
    # b_ref: (1, N_PAD)     f32   -- zero-padded bias
    # o_ref: (tile_b, N_PAD) f32  -- lane-dense padded logits
    x = x_ref[...].astype(jnp.bfloat16)
    w = w_ref[...]
    # out[m, n] = sum_k x[m, k] * w[n, k]   (contract dim 1 of both -> MXU)
    out = lax.dot_general(
        x, w,
        dimension_numbers=(((1,), (1,)), ((), ())),
        preferred_element_type=jnp.float32,
    )
    o_ref[...] = out + b_ref[...]


def prepare_params(weight, bias):
    """Pad nn.Linear params once (hoisted out of the per-call forward).

    weight: (10, 784) f32   bias: (10,) f32
    returns (w_pad (128, 784) bf16, b_pad (1, 128) f32)
    """
    w_pad = jnp.zeros((N_PAD, INPUT_SIZE), dtype=jnp.bfloat16)
    w_pad = w_pad.at[:NUM_CLASSES].set(weight.astype(jnp.bfloat16))
    b_pad = jnp.zeros((1, N_PAD), dtype=jnp.float32)
    b_pad = b_pad.at[0, :NUM_CLASSES].set(bias.astype(jnp.float32))
    return w_pad, b_pad


@functools.partial(jax.jit, static_argnames=("max_tile_b",))
def mnist_model_forward(xb, w_pad, b_pad, *, max_tile_b=MAX_TILE_B):
    """Forward pass of MnistModel.

    xb:    (B, 1, 28, 28) float32 (NCHW, as PyTorch would feed it)
    w_pad: (128, 784) bf16, b_pad: (1, 128) f32  (from prepare_params)
    returns (B, 10) float32 logits.
    """
    B = xb.shape[0]
    x = xb.reshape(B, INPUT_SIZE).astype(jnp.float32)

    # Adaptive batch tile: multiple of the f32 sublane pack (8), capped at
    # MAX_TILE_B.  Small batches -> one small tile, no padded copy of x.
    tile_b = min(max_tile_b, _round_up(B, 8))
    num_tiles = pl.cdiv(B, tile_b)
    b_padded = num_tiles * tile_b
    if b_padded != B:
        x = jnp.pad(x, ((0, b_padded - B), (0, 0)))

    out_padded = pl.pallas_call(
        linear_kernel,
        out_shape=jax.ShapeDtypeStruct((b_padded, N_PAD), jnp.float32),
        grid_spec=pltpu.PrefetchScalarGridSpec(
            num_scalar_prefetch=0,
            grid=(num_tiles,),
            in_specs=[
                # x: one batch tile per grid step (double-buffered by Pallas).
                pl.BlockSpec((tile_b, INPUT_SIZE), lambda i: (i, 0)),
                # weight / bias: constant index_map -> resident in VMEM.
                pl.BlockSpec((N_PAD, INPUT_SIZE), lambda i: (0, 0)),
                pl.BlockSpec((1, N_PAD), lambda i: (0, 0)),
            ],
            out_specs=pl.BlockSpec((tile_b, N_PAD), lambda i: (i, 0)),
        ),
        compiler_params=pltpu.CompilerParams(
            dimension_semantics=("parallel",),
            # Double-buffered 2048x784 f32 x-tiles (~12.5 MiB) + output tiles
            # exceed v5e's 16 MiB scoped default; 48 MiB is safe on all gens.
            vmem_limit_bytes=48 * 1024 * 1024,
        ),
        cost_estimate=pl.CostEstimate(
            flops=2 * b_padded * INPUT_SIZE * N_PAD,
            transcendentals=0,
            bytes_accessed=(b_padded * INPUT_SIZE * 4      # x (f32, read once)
                            + N_PAD * INPUT_SIZE * 2       # weight (bf16)
                            + b_padded * N_PAD * 4),       # logits (f32)
        ),
    )(x, w_pad, b_pad)

    # Strip batch and class padding.
    return out_padded[:B, :NUM_CLASSES]


def init_params(key):
    """Deterministic init matching nn.Linear(784, 10) shapes.

    PyTorch default init: U(-1/sqrt(fan_in), 1/sqrt(fan_in)) for both W and b.
    """
    kw, kb = jax.random.split(key)
    bound = 1.0 / math.sqrt(INPUT_SIZE)
    weight = jax.random.uniform(
        kw, (NUM_CLASSES, INPUT_SIZE), jnp.float32, minval=-bound, maxval=bound
    )
    bias = jax.random.uniform(
        kb, (NUM_CLASSES,), jnp.float32, minval=-bound, maxval=bound
    )
    return weight, bias


if __name__ == "__main__":
    key = jax.random.PRNGKey(0)
    k_params, k_x = jax.random.split(key)

    weight, bias = init_params(k_params)
    w_pad, b_pad = prepare_params(weight, bias)   # padded once, reused per call

    # Small MNIST-like batch: (B=8, C=1, H=28, W=28), NCHW like PyTorch.
    B = 8
    xb = jax.random.normal(k_x, (B, 1, 28, 28), dtype=jnp.float32)

    logits = mnist_model_forward(xb, w_pad, b_pad)
    logits = jax.block_until_ready(logits)

    # Reference check against plain JAX f32 (same math as nn.Linear forward).
    # Tolerance covers the in-kernel bf16 cast of the matmul inputs.
    ref = xb.reshape(B, INPUT_SIZE) @ weight.T + bias
    assert logits.shape == (B, NUM_CLASSES)
    assert jnp.allclose(logits, ref, atol=2e-2, rtol=2e-2), (
        float(jnp.max(jnp.abs(logits - ref)))
    )

    print("KERNEL_OK")
</pallas_src>

<mosaic_0001>
module attributes {stable_mosaic.version = 11 : i64} {
  func.func @linear_kernel(%arg0: i32, %arg1: memref<8x784xf32, #tpu.memory_space<vmem>>, %arg2: memref<128x784xbf16, #tpu.memory_space<vmem>>, %arg3: memref<1x128xf32, #tpu.memory_space<vmem>>, %arg4: memref<8x128xf32, #tpu.memory_space<vmem>>) attributes {dimension_semantics = [#tpu.dimension_semantics<parallel>], iteration_bounds = array<i64: 1>, scalar_prefetch = 0 : i64, scratch_operands = 0 : i64, tpu.core_type = #tpu.core_type<tc>, window_params = [{transform_indices = @transform_0, window_bounds = array<i64: 8, 784>}, {pipeline_mode = #tpu.pipeline_mode<synchronous>, transform_indices = @transform_1, window_bounds = array<i64: 128, 784>}, {pipeline_mode = #tpu.pipeline_mode<synchronous>, transform_indices = @transform_2, window_bounds = array<i64: 1, 128>}, {transform_indices = @transform_3, window_bounds = array<i64: 8, 128>}]} {
    %c0 = arith.constant 0 : index
    %c0_0 = arith.constant 0 : index
    %0 = vector.load %arg1[%c0, %c0_0] : memref<8x784xf32, #tpu.memory_space<vmem>>, vector<8x784xf32>
    %1 = arith.truncf %0 : vector<8x784xf32> to vector<8x784xbf16>
    %c0_1 = arith.constant 0 : index
    %c0_2 = arith.constant 0 : index
    %2 = vector.load %arg2[%c0_1, %c0_2] : memref<128x784xbf16, #tpu.memory_space<vmem>>, vector<128x784xbf16>
    %cst = arith.constant dense<0.000000e+00> : vector<8x128xf32>
    %3 = tpu.matmul %1, %2, %cst {dimension_numbers = #tpu.dot_dimension_numbers<[1], [1], [0], [0], [0, 0, 1, 0], [], []>} : vector<8x784xbf16>, vector<128x784xbf16>, vector<8x128xf32> -> vector<8x128xf32>
    %c0_3 = arith.constant 0 : index
    %c0_4 = arith.constant 0 : index
    %4 = vector.load %arg3[%c0_3, %c0_4] : memref<1x128xf32, #tpu.memory_space<vmem>>, vector<1x128xf32>
    %5 = vector.broadcast %4 : vector<1x128xf32> to vector<8x128xf32>
    %6 = arith.addf %3, %5 : vector<8x128xf32>
    %c0_5 = arith.constant 0 : index
    %c0_6 = arith.constant 0 : index
    %7 = vector.load %arg4[%c0_5, %c0_6] : memref<8x128xf32, #tpu.memory_space<vmem>>, vector<8x128xf32>
    tpu.vector_store %arg4[%c0_5, %c0_6], %6 {strides = array<i32>} : memref<8x128xf32, #tpu.memory_space<vmem>>, vector<8x128xf32>,
    return
  }
  func.func @transform_0(%arg0: i32) -> (i32, i32) {
    %c0_i32 = arith.constant 0 : i32
    %c0_i32_0 = arith.constant 0 : i32
    return %arg0, %c0_i32 : i32, i32
  }
  func.func @transform_1(%arg0: i32) -> (i32, i32) {
    %c0_i32 = arith.constant 0 : i32
    %c0_i32_0 = arith.constant 0 : i32
    %c0_i32_1 = arith.constant 0 : i32
    return %c0_i32, %c0_i32_0 : i32, i32
  }
  func.func @transform_2(%arg0: i32) -> (i32, i32) {
    %c0_i32 = arith.constant 0 : i32
    %c0_i32_0 = arith.constant 0 : i32
    %c0_i32_1 = arith.constant 0 : i32
    return %c0_i32, %c0_i32_0 : i32, i32
  }
  func.func @transform_3(%arg0: i32) -> (i32, i32) {
    %c0_i32 = arith.constant 0 : i32
    %c0_i32_0 = arith.constant 0 : i32
    return %arg0, %c0_i32 : i32, i32
  }
}

</mosaic_0001>

<bundles_post_ra>
// kernel: mnist_model_forward.1
= control target key start
LH: loop header
LB: loop body
LE: loop exit
PB: predicated region body
PF: predicated region fallthrough
CT: control target
= control target key end

     0   :  { %s1033_s0 = inlined_call_operand.vmem [shape: f32[8,784], index: 0, kind: input, shape index: {}]   ;;  %s1034_s1 = inlined_call_operand.vmem [shape: bf16[128,784], index: 1, kind: input, shape index: {}]   ;;  %s1035_s2 = inlined_call_operand.vmem [shape: f32[1,128], index: 2, kind: input, shape index: {}]   ;;  %s1036_s3 = inlined_call_operand.hbm [shape: f32[8,128], index: 3, kind: output, shape index: {}]  }
   0x1   :  { %v684_v0 = vld [vmem:[%s1034_s1 + $0x4] ss:$28 sps:$4 sm:$0xff]   ;;  %v686_v1 = vld [vmem:[%s1034_s1 + $0x14] ss:$28 sps:$4 sm:$0xff]   ;;  %v690_v4 = vld [vmem:[%s1034_s1 + $0x3c] ss:$28 sps:$4 sm:$0xff]  }
   0x2   :  { %409 = vmatprep.subr.bf16.mxu1 %v684_v0  ;;  %v688_v2 = vld [vmem:[%s1034_s1] ss:$28 sps:$4 sm:$0xff]   ;;  %v689_v3 = vld [vmem:[%s1034_s1 + $0x10] ss:$28 sps:$4 sm:$0xff]   ;;  %489 = vmatprep.subr.bf16.mxu0 %v686_v1  ;;  %v694_v6 = vld [vmem:[%s1034_s1 + $0x38] ss:$28 sps:$4 sm:$0xff]  }
   0x3   :  { %410 = vmatpush1.bf16.xpose.msra.mxu1 %v688_v2  ;;  %490 = vmatpush1.bf16.xpose.msra.mxu0 %v689_v3  ;;  %v692_v5 = vld [vmem:[%s1034_s1 + $0x4c] ss:$28 sps:$4 sm:$0xff]   ;;  %v696_v8 = vld [vmem:[%s1034_s1 + $0x74] ss:$28 sps:$4 sm:$0xff]   ;;  %v698_v9 = vld [vmem:[%s1034_s1 + $0x84] ss:$28 sps:$4 sm:$0xff]  }
   0x4   :  { %411 = vmatprep.subr.bf16.mxu1 %v690_v4  ;;  %491 = vmatprep.subr.bf16.mxu0 %v692_v5  ;;  %v695_v7 = vld [vmem:[%s1034_s1 + $0x48] ss:$28 sps:$4 sm:$0xff]   ;;  %v700_v10 = vld [vmem:[%s1034_s1 + $0x70] ss:$28 sps:$4 sm:$0xff]   ;;  %v701_v11 = vld [vmem:[%s1034_s1 + $0x80] ss:$28 sps:$4 sm:$0xff]  }
   0x5   :  { %v702_v12 = vld [vmem:[%s1034_s1 + $0xac] ss:$28 sps:$4 sm:$0xff]   ;;  %v704_v13 = vld [vmem:[%s1034_s1 + $0xbc] ss:$28 sps:$4 sm:$0xff]   ;;  %v708_v19 = vld [vmem:[%s1034_s1 + $0xe4] ss:$28 sps:$4 sm:$0xff]  }
   0x6   :  { %v17_v14 = vld [vmem:[%s1033_s0 + $0x8] sm:$0xff]  ;;  %v707_v17 = vld [vmem:[%s1034_s1 + $0xb8] ss:$28 sps:$4 sm:$0xff]   ;;  %v712_v22 = vld [vmem:[%s1034_s1 + $0xe0] ss:$28 sps:$4 sm:$0xff]  }
   0x7   :  { %v24_v15 = vpack.c.bf16 %v17_v14, %v17_v14  ;;  %v706_v16 = vld [vmem:[%s1034_s1 + $0xa8] ss:$28 sps:$4 sm:$0xff]   ;;  %v710_v21 = vld [vmem:[%s1034_s1 + $0xf4] ss:$28 sps:$4 sm:$0xff]   ;;  %v714_v24 = vld [vmem:[%s1034_s1 + $0x11c] ss:$28 sps:$4 sm:$0xff]  }
   0x8   :  { %v21_v18 = vld [vmem:[%s1033_s0 + $0x28] sm:$0xff]  ;;  %v718_v26 = vld [vmem:[%s1034_s1 + $0x118] ss:$28 sps:$4 sm:$0xff]   ;;  %v722_v29 = vld [vmem:[%s1034_s1 + $0x164] ss:$28 sps:$4 sm:$0xff]  }
   0x9   :  { %441 = vmatprep.mubr.bf16.mxu1 %v24_v15  ;;  %v28_v20 = vpack.c.bf16 %v21_v18, %v21_v18  ;;  %v713_v23 = vld [vmem:[%s1034_s1 + $0xf0] ss:$28 sps:$4 sm:$0xff]   ;;  %v719_v27 = vld [vmem:[%s1034_s1 + $0x128] ss:$28 sps:$4 sm:$0xff]  }
   0xa   :  { %v716_v25 = vld [vmem:[%s1034_s1 + $0x12c] ss:$28 sps:$4 sm:$0xff]   ;;  %v720_v28 = vld [vmem:[%s1034_s1 + $0x154] ss:$28 sps:$4 sm:$0xff]  }
   0xb   :  { %412 = vmatpush1.bf16.xpose.msra.mxu1 %v694_v6  ;;  %492 = vmatpush1.bf16.xpose.msra.mxu0 %v695_v7 }
   0xc   :  { %413 = vmatprep.subr.bf16.mxu1 %v696_v8  ;;  %493 = vmatprep.subr.bf16.mxu0 %v698_v9 }
   0xd   :  { %521 = vmatprep.mubr.bf16.mxu0 %v28_v20 }
  0x13   :  { %414 = vmatpush1.bf16.xpose.msra.mxu1 %v700_v10  ;;  %494 = vmatpush1.bf16.xpose.msra.mxu0 %v701_v11 }
  0x14   :  { %415 = vmatprep.subr.bf16.mxu1 %v702_v12  ;;  %495 = vmatprep.subr.bf16.mxu0 %v704_v13 }
  0x1b   :  { %416 = vmatpush1.bf16.xpose.msra.mxu1 %v706_v16  ;;  %496 = vmatpush1.bf16.xpose.msra.mxu0 %v707_v17 }
  0x1c   :  { %417 = vmatprep.subr.bf16.mxu1 %v708_v19  ;;  %497 = vmatprep.subr.bf16.mxu0 %v710_v21 }
  0x23   :  { %418 = vmatpush1.bf16.xpose.msra.mxu1 %v712_v22  ;;  %498 = vmatpush1.bf16.xpose.msra.mxu0 %v713_v23 }
  0x24   :  { %419 = vmatprep.subr.bf16.mxu1 %v714_v24  ;;  %499 = vmatprep.subr.bf16.mxu0 %v716_v25 }
  0x25   :  { %8 = vsyncpa [#allocation3], 0  ;;  %v724_v30 = vld [vmem:[%s1034_s1 + $0x150] ss:$28 sps:$4 sm:$0xff]   ;;  %v725_v31 = vld [vmem:[%s1034_s1 + $0x160] ss:$28 sps:$4 sm:$0xff]  }
  0x26   :  { %v726_v32 = vld [vmem:[%s1034_s1 + $0x18c] ss:$28 sps:$4 sm:$0xff]   ;;  %v728_v33 = vld [vmem:[%s1034_s1 + $0x19c] ss:$28 sps:$4 sm:$0xff]   ;;  %v16_v37 = vld [vmem:[%s1033_s0] sm:$0xff]  ;;  %v788_v39 = vmov 0.0  }
  0x27   :  { %v730_v34 = vld [vmem:[%s1034_s1 + $0x188] ss:$28 sps:$4 sm:$0xff]   ;;  %v731_v35 = vld [vmem:[%s1034_s1 + $0x198] ss:$28 sps:$4 sm:$0xff]   ;;  %vm381_vm0 = vcmask 130048   ;;  %v23_v41 = vpack.c.bf16 %v16_v37, %v16_v37  ;;  %vm789_vm1 = vmmov 0  }
  0x28   :  { %v734_v36 = vld [vmem:[%s1034_s1 + $0xc] ss:$28 sps:$4 sm:$0xff]   ;;  %v20_v38 = vld [vmem:[%s1033_s0 + $0x20] sm:$0xff]  ;;  %v735_v40 = vld [vmem:[%s1034_s1 + $0x18] ss:$28 sps:$4 sm:$0xff]  }
  0x29   :  { %v27_v42 = vpack.c.bf16 %v20_v38, %v20_v38  ;;  %v19_v43 = vld [vmem:[%s1033_s0 + $0x18] sm:$0xff]  ;;  %v732_v44 = vld [vmem:[%s1034_s1 + $0x8] ss:$28 sps:$4 sm:$0xff]   ;;  %v386_v45 = vsel %vm381_vm0, %v735_v40, 0  ;;  %v739_v48 = vld [vmem:[%s1034_s1 + $0x50] ss:$28 sps:$4 sm:$0xff]  }
  0x2a   :  { %v738_v46 = vld [vmem:[%s1034_s1 + $0x44] ss:$28 sps:$4 sm:$0xff]   ;;  %v26_v47 = vpack.c.bf16 %v19_v43, %v19_v43  ;;  %v389_v50 = vsel %vm381_vm0, %v739_v48, 0  ;;  %v742_v51 = vld [vmem:[%s1034_s1 + $0x7c] ss:$28 sps:$4 sm:$0xff]   ;;  %v18_v11 = vld [vmem:[%s1033_s0 + $0x10] sm:$0xff] }
  0x2b   :  { %420 = vmatpush1.bf16.xpose.msra.mxu1 %v718_v26  ;;  %500 = vmatpush1.bf16.xpose.msra.mxu0 %v719_v27  ;;  %v736_v49 = vld [vmem:[%s1034_s1 + $0x40] ss:$28 sps:$4 sm:$0xff]   ;;  %v743_v52 = vld [vmem:[%s1034_s1 + $0x88] ss:$28 sps:$4 sm:$0xff]   ;;  %v740_v53 = vld [vmem:[%s1034_s1 + $0x78] ss:$28 sps:$4 sm:$0xff]   ;;  %v25_v13 = vpack.c.bf16 %v18_v11, %v18_v11 }
  0x2c   :  { %421 = vmatprep.subr.bf16.mxu1 %v720_v28  ;;  %501 = vmatprep.subr.bf16.mxu0 %v722_v29  ;;  %v392_v54 = vsel %vm381_vm0, %v743_v52, 0  ;;  %v746_v55 = vld [vmem:[%s1034_s1 + $0xb4] ss:$28 sps:$4 sm:$0xff]   ;;  %v747_v56 = vld [vmem:[%s1034_s1 + $0xc0] ss:$28 sps:$4 sm:$0xff]  }
  0x2d   :  { %v744_v57 = vld [vmem:[%s1034_s1 + $0xb0] ss:$28 sps:$4 sm:$0xff]   ;;  %v395_v58 = vsel %vm381_vm0, %v747_v56, 0  ;;  %v751_v60 = vld [vmem:[%s1034_s1 + $0xf8] ss:$28 sps:$4 sm:$0xff]  }
  0x2e   :  { %v750_v59 = vld [vmem:[%s1034_s1 + $0xec] ss:$28 sps:$4 sm:$0xff]   ;;  %v398_v62 = vsel %vm381_vm0, %v751_v60, 0  ;;  %v754_v63 = vld [vmem:[%s1034_s1 + $0x124] ss:$28 sps:$4 sm:$0xff]   ;;  %v22_v12 = vld [vmem:[%s1033_s0 + $0x30] sm:$0xff] }
  0x2f   :  { %v748_v61 = vld [vmem:[%s1034_s1 + $0xe8] ss:$28 sps:$4 sm:$0xff]   ;;  %v755_v0 = vld [vmem:[%s1034_s1 + $0x130] ss:$28 sps:$4 sm:$0xff]   ;;  %v752_v1 = vld [vmem:[%s1034_s1 + $0x120] ss:$28 sps:$4 sm:$0xff]   ;;  %v29_v14 = vpack.c.bf16 %v22_v12, %v22_v12 }
  0x30   :  { %v401_v2 = vsel %vm381_vm0, %v755_v0, 0  ;;  %v758_v3 = vld [vmem:[%s1034_s1 + $0x15c] ss:$28 sps:$4 sm:$0xff]   ;;  %v759_v4 = vld [vmem:[%s1034_s1 + $0x168] ss:$28 sps:$4 sm:$0xff]  }
  0x31   :  { %v756_v5 = vld [vmem:[%s1034_s1 + $0x158] ss:$28 sps:$4 sm:$0xff]   ;;  %v404_v6 = vsel %vm381_vm0, %v759_v4, 0  ;;  %v763_v8 = vld [vmem:[%s1034_s1 + $0x1a0] ss:$28 sps:$4 sm:$0xff]  }
  0x32   :  { %v762_v7 = vld [vmem:[%s1034_s1 + $0x194] ss:$28 sps:$4 sm:$0xff]   ;;  %v407_v10 = vsel %vm381_vm0, %v763_v8, 0  ;;  %v584_v15 = vld [vmem:[%s1035_s2] ss:$0 sm:$0xff] }
  0x33   :  { %422 = vmatpush1.bf16.xpose.msra.mxu1 %v724_v30  ;;  %502 = vmatpush1.bf16.xpose.msra.mxu0 %v725_v31  ;;  %v760_v9 = vld [vmem:[%s1034_s1 + $0x190] ss:$28 sps:$4 sm:$0xff]   ;;  %s790_s1 = smov [#allocation2]  }
  0x34   :  { %423 = vmatprep.subr.bf16.mxu1 %v726_v32  ;;  %503 = vmatprep.subr.bf16.mxu0 %v728_v33  ;;  %s576_s5 = sshll.u32 %s790_s1, 4  ;;  %s577_s5 = int_to_ptr.vmem [resolvable:$true] %s576_s5 }
  0x35   :  { %s764_s0 = scalar_lea.vmem %s577_s5, 128  ;;  %p769_p1 = scmp.lt.s32.totalorder %s577_s5, %s577_s5 }
  0x36   :  { %p765_p0 = scmp.ne.s32.totalorder %s577_s5, %s764_s0  ;;  %p770_p2 = scmp.lt.s32.totalorder %s764_s0, %s764_s0 }
  0x38   :  { %p771_p3 = por %p770_p2, %p769_p1 }
  0x3a   :  { %p772_p4 = pnand %p771_p3, %p765_p0 }
  0x3b   :  { %424 = vmatpush1.bf16.xpose.msra.mxu1 %v730_v34  ;;  %504 = vmatpush1.bf16.xpose.msra.mxu0 %v731_v35 }
  0x3c   :  { %449 = vmatprep.subr.bf16.mxu1 %v734_v36  ;;  %651 = vmatprep.subr.bf16.mxu0 %v788_v39 }
  0x42   :  { %442 = vmatmul.mubr.bf16.vlgmr.msra.gmra.mrb[0].mxu1 %v23_v41  ;;  %522 = vmatmul.mubr.bf16.vlgmr.msra.gmra.mrb[0].mxu0 %v27_v42 }
  0x43   :  { %450 = vmatpush1.bf16.xpose.msra.mxu1 %v732_v44  ;;  %652 = vmatpush3.bf16.xpose.msra.mxu0 %v386_v45 }
  0x44   :  { %451 = vmatprep.subr.bf16.mxu1 %v738_v46  ;;  %653 = vmatprep.subr.bf16.mxu0 %v788_v39 }
  0x45   :  { %481 = vmatprep.mubr.bf16.mxu1 %v26_v47  ;;  %667 = vmatprep.mubr.msk.bf16.mxu0 %vm789_vm1, %v788_v39 }
  0x4b   :  { %452 = vmatpush1.bf16.xpose.msra.mxu1 %v736_v49  ;;  %654 = vmatpush3.bf16.xpose.msra.mxu0 %v389_v50 }
  0x4c   :  { %453 = vmatprep.subr.bf16.mxu1 %v742_v51  ;;  %655 = vmatprep.subr.bf16.mxu0 %v788_v39 }
  0x53   :  { %454 = vmatpush1.bf16.xpose.msra.mxu1 %v740_v53  ;;  %656 = vmatpush3.bf16.xpose.msra.mxu0 %v392_v54 }
  0x54   :  { %455 = vmatprep.subr.bf16.mxu1 %v746_v55  ;;  %657 = vmatprep.subr.bf16.mxu0 %v788_v39 }
  0x5b   :  { %456 = vmatpush1.bf16.xpose.msra.mxu1 %v744_v57  ;;  %658 = vmatpush3.bf16.xpose.msra.mxu0 %v395_v58 }
  0x5c   :  { %457 = vmatprep.subr.bf16.mxu1 %v750_v59  ;;  %659 = vmatprep.subr.bf16.mxu0 %v788_v39 }
  0x63   :  { %458 = vmatpush1.bf16.xpose.msra.mxu1 %v748_v61  ;;  %660 = vmatpush3.bf16.xpose.msra.mxu0 %v398_v62 }
  0x64   :  { %459 = vmatprep.subr.bf16.mxu1 %v754_v63  ;;  %661 = vmatprep.subr.bf16.mxu0 %v788_v39 }
  0x6b   :  { %460 = vmatpush1.bf16.xpose.msra.mxu1 %v752_v1  ;;  %662 = vmatpush3.bf16.xpose.msra.mxu0 %v401_v2 }
  0x6c   :  { %461 = vmatprep.subr.bf16.mxu1 %v758_v3  ;;  %663 = vmatprep.subr.bf16.mxu0 %v788_v39 }
  0x73   :  { %462 = vmatpush1.bf16.xpose.msra.mxu1 %v756_v5  ;;  %664 = vmatpush3.bf16.xpose.msra.mxu0 %v404_v6 }
  0x74   :  { %463 = vmatprep.subr.bf16.mxu1 %v762_v7  ;;  %665 = vmatprep.subr.bf16.mxu0 %v788_v39 }
  0x7b   :  { %464 = vmatpush1.bf16.xpose.msra.mxu1 %v760_v9  ;;  %666 = vmatpush3.bf16.xpose.msra.mxu0 %v407_v10 }
  0x82   :  { %482 = vmatmul.mubr.bf16.vlgmr.msra.gmra.mrb[0].mxu1 %v25_v13  ;;  %668 = vmatmul.mubr.msk.bf16.vlgmr.msra.gmra.mrb[0].mxu0 %vm381_vm0, %v29_v14 }
 0x155   :  { %v483_v16 = vpop.f32.mrb[0].mxu1  ;;  %v563_v17 = vpop.f32.mrb[0].mxu0 }
 0x156   :  { %v671_v18 = vadd.f32 %v584_v15, %v483_v16  ;;  %v485_v19 = vpop.f32.mrb[1].mxu1  ;;  %v669_v20 = vpop.f32.mrb[1].mxu0 }
 0x157   :  { %v486_v21 = vpop.f32.mrb[2].mxu1  ;;  %v566_v22 = vpop.f32.mrb[2].mxu0 }
 0x158   :  { %v672_v23 = vadd.f32 %v671_v18, %v563_v17  ;;  %v487_v24 = vpop.f32.mrb[3].mxu1  ;;  %v670_v25 = vpop.f32.mrb[3].mxu0 }
 0x15a   :  { %569 = vst [vmem:[#allocation2] sm:$0xff] %v672_v23 }
 0x15b   :  { %775 = shalt.err (!%p772_p4)
}
 0x15c   :  { %s776_s7 = scalar_lea.hbm %s1036_s3, 128 }
 0x15d   :  { %p777_p5 = scmp.ne.s32.totalorder %s1036_s3, %s776_s7  ;;  %p780_p6 = scmp.lt.u32.totalorder %s776_s7, %s1036_s3 }
 0x15f   :  { %p782_p7 = pnand %p780_p6, %p777_p5 }
 0x161   :  { %785 = shalt.err (!%p782_p7)
}
 0x162   :  { %579 = dma.vmem_to_hbm [thread:$0]  %s577_s5, 128, %s1036_s3, [#allocation3]  }
 0x163   :  { %786 = dma.done.wait [#allocation3], 128  }
 0x164   :  { %787 = vsyncadd [#allocation3], 4294967168 }
 0x165   :  { %583 = vsyncpa [#allocation3], 1 }

</bundles_post_ra>
